<compile_context>
chip_gen: v5e
topology: v5e:2x2
jax: 0.10.0
libtpu: 0.0.40
codegen_flags: <defaults>
</compile_context>

<pallas_src>
import functools

import jax
import jax.numpy as jnp
from jax.experimental import pallas as pl
from jax.experimental.pallas import tpu as pltpu

HIDDEN = 256
LANE = 128
MAX_BLOCK_B = 4096       # max rows per grid step (VMEM-safe on v5e/v6e/v7x)
SPLIT_THRESHOLD = 32     # above this, force >= 2 grid blocks (v7x megacore)


def _round_up(n: int, m: int) -> int:
    return ((n + m - 1) // m) * m


def _cdiv(a: int, b: int) -> int:
    return (a + b - 1) // b


@functools.lru_cache(maxsize=1)
def _bf16_elementwise_default() -> bool:
    """v6e/v7x VPUs are bf16-native; v5e (and older) are not."""
    try:
        kind = jax.devices()[0].device_kind.lower()
    except Exception:
        return False
    return not any(v in kind for v in ("v2", "v3", "v4", "v5"))


def policy_kernel(x_ref, w1_ref, b1_ref, w2_ref, b2_ref, w3_ref, b3_ref, o_ref,
                  *, bf16_elementwise: bool):
    """One batch tile through all three layers.

    x tile: [Bt, D] f32 (cast to bf16 in-kernel for the MXU).
    Weights: bf16, resident in VMEM across the whole grid (index_map -> (0,0)).
    Biases:  f32.  All matmuls accumulate in f32 on the MXU.  The bias/ReLU
    chain runs in bf16 on v6e/v7x and in f32 on v5e.
    """
    act = jnp.bfloat16 if bf16_elementwise else jnp.float32

    x = x_ref[...].astype(jnp.bfloat16)

    # fc1 + ReLU
    h1 = jnp.dot(x, w1_ref[...], preferred_element_type=jnp.float32)
    h1 = jnp.maximum(h1.astype(act) + b1_ref[...].astype(act), 0.0)
    h1 = h1.astype(jnp.bfloat16)

    # fc2 + ReLU
    h2 = jnp.dot(h1, w2_ref[...], preferred_element_type=jnp.float32)
    h2 = jnp.maximum(h2.astype(act) + b2_ref[...].astype(act), 0.0)
    h2 = h2.astype(jnp.bfloat16)

    # fc3 (no activation) -> lane-dense padded logits tile [Bt, A_pad]
    out = jnp.dot(h2, w3_ref[...], preferred_element_type=jnp.float32) + b3_ref[...]
    o_ref[...] = out.astype(o_ref.dtype)


def prepare_params(params):
    """One-time (out of the hot path) conversion of f32 [in, out] params:
    cast weights to bf16 and pad fc3 columns up to a multiple of 128 lanes."""
    A = params["w3"].shape[1]
    A_pad = _round_up(max(A, LANE), LANE)
    w3 = params["w3"].astype(jnp.bfloat16)
    b3 = params["b3"].astype(jnp.float32)
    if A_pad != A:
        w3 = jnp.pad(w3, ((0, 0), (0, A_pad - A)))
        b3 = jnp.pad(b3, ((0, 0), (0, A_pad - A)))
    return {
        "w1": params["w1"].astype(jnp.bfloat16),
        "b1": params["b1"].astype(jnp.float32),
        "w2": params["w2"].astype(jnp.bfloat16),
        "b2": params["b2"].astype(jnp.float32),
        "w3": w3,
        "b3": b3,
    }


@functools.partial(jax.jit, static_argnames=("n_actions", "bf16_elementwise"))
def policy_forward(x, prepared, *, n_actions: int, bf16_elementwise=None):
    """x: [B, input_dims] float32; prepared: output of prepare_params."""
    if bf16_elementwise is None:
        bf16_elementwise = _bf16_elementwise_default()

    B, D = x.shape
    H = prepared["w1"].shape[1]
    A_pad = prepared["w3"].shape[1]

    # Batch tiling: one block for tiny batches, otherwise at least two blocks
    # (so both v7x TensorCores get work), capped at MAX_BLOCK_B rows/block.
    if B <= SPLIT_THRESHOLD:
        n_blocks = 1
    else:
        n_blocks = max(2, _cdiv(B, MAX_BLOCK_B))
    bt = _round_up(_cdiv(B, n_blocks), 16)
    B_pad = n_blocks * bt
    if B_pad != B:
        x = jnp.pad(x, ((0, B_pad - B), (0, 0)))

    kernel = functools.partial(policy_kernel, bf16_elementwise=bf16_elementwise)

    out = pl.pallas_call(
        kernel,
        out_shape=jax.ShapeDtypeStruct((B_pad, A_pad), jnp.bfloat16),
        grid=(n_blocks,),
        in_specs=[
            pl.BlockSpec((bt, D), lambda i: (i, 0)),       # x: tiled over batch
            pl.BlockSpec((D, H), lambda i: (0, 0)),        # w1: resident
            pl.BlockSpec((1, H), lambda i: (0, 0)),        # b1: resident
            pl.BlockSpec((H, H), lambda i: (0, 0)),        # w2: resident
            pl.BlockSpec((1, H), lambda i: (0, 0)),        # b2: resident
            pl.BlockSpec((H, A_pad), lambda i: (0, 0)),    # w3 (padded): resident
            pl.BlockSpec((1, A_pad), lambda i: (0, 0)),    # b3 (padded): resident
        ],
        out_specs=pl.BlockSpec((bt, A_pad), lambda i: (i, 0)),
        compiler_params=pltpu.CompilerParams(
            # Batch axis is independent -> v7x megacore splits it across TCs.
            dimension_semantics=("parallel",),
            # Large tiles + f32 intermediates on v5e exceed its 16 MiB scoped
            # default; 48 MiB is still < physical VMEM on every generation.
            vmem_limit_bytes=48 * 1024 * 1024,
        ),
    )(x, prepared["w1"], prepared["b1"], prepared["w2"], prepared["b2"],
      prepared["w3"], prepared["b3"])

    return out[:B, :n_actions].astype(jnp.float32)


def init_policy_params(key, input_dims, n_actions, hidden=HIDDEN):
    """Deterministic init mimicking torch.nn.Linear (uniform +/- 1/sqrt(fan_in)).
    Weights stored as [in, out] (transpose of torch's [out, in])."""
    ks = jax.random.split(key, 6)

    def lin(kw, kb, fan_in, fan_out):
        bound = 1.0 / jnp.sqrt(fan_in)
        w = jax.random.uniform(kw, (fan_in, fan_out), jnp.float32, -bound, bound)
        b = jax.random.uniform(kb, (1, fan_out), jnp.float32, -bound, bound)
        return w, b

    w1, b1 = lin(ks[0], ks[1], input_dims, hidden)
    w2, b2 = lin(ks[2], ks[3], hidden, hidden)
    w3, b3 = lin(ks[4], ks[5], hidden, n_actions)
    return {"w1": w1, "b1": b1, "w2": w2, "b2": b2, "w3": w3, "b3": b3}


def policy_ref(x, p):
    """Pure-JAX reference with bf16 matmul operands / f32 accumulate (matches
    the kernel's math up to bf16 rounding of activations/output)."""
    bf = jnp.bfloat16
    h1 = jnp.maximum(
        jnp.dot(x.astype(bf), p["w1"].astype(bf),
                preferred_element_type=jnp.float32) + p["b1"], 0.0)
    h2 = jnp.maximum(
        jnp.dot(h1.astype(bf), p["w2"].astype(bf),
                preferred_element_type=jnp.float32) + p["b2"], 0.0)
    return jnp.dot(h2.astype(bf), p["w3"].astype(bf),
                   preferred_element_type=jnp.float32) + p["b3"]


if __name__ == "__main__":
    key = jax.random.PRNGKey(0)
    k_x, k_x2, k_p = jax.random.split(key, 3)

    input_dims, n_actions = 32, 4
    params = init_policy_params(k_p, input_dims, n_actions)
    prepared = prepare_params(params)          # one-time cast/pad, out of hot path

    # Small per-step batch (single grid block).
    x_small = jax.random.normal(k_x, (8, input_dims), jnp.float32)
    out_small = jax.block_until_ready(
        policy_forward(x_small, prepared, n_actions=n_actions))

    # Larger rollout-style batch: exercises the 2-block grid with resident weights.
    x_big = jax.random.normal(k_x2, (512, input_dims), jnp.float32)
    out_big = jax.block_until_ready(
        policy_forward(x_big, prepared, n_actions=n_actions))

    ref_small = policy_ref(x_small, params)
    ref_big = policy_ref(x_big, params)

    assert out_small.shape == (8, n_actions)
    assert out_big.shape == (512, n_actions)
    assert jnp.allclose(out_small, ref_small, atol=3e-2, rtol=3e-2), "small-batch mismatch"
    assert jnp.allclose(out_big, ref_big, atol=3e-2, rtol=3e-2), "large-batch mismatch"

    print("KERNEL_OK")
</pallas_src>

<mosaic_0001>
module attributes {stable_mosaic.version = 11 : i64} {
  func.func @policy_kernel(%arg0: i32, %arg1: memref<16x32xf32, #tpu.memory_space<vmem>>, %arg2: memref<32x256xbf16, #tpu.memory_space<vmem>>, %arg3: memref<1x256xf32, #tpu.memory_space<vmem>>, %arg4: memref<256x256xbf16, #tpu.memory_space<vmem>>, %arg5: memref<1x256xf32, #tpu.memory_space<vmem>>, %arg6: memref<256x128xbf16, #tpu.memory_space<vmem>>, %arg7: memref<1x128xf32, #tpu.memory_space<vmem>>, %arg8: memref<16x128xbf16, #tpu.memory_space<vmem>>) attributes {dimension_semantics = [#tpu.dimension_semantics<parallel>], iteration_bounds = array<i64: 1>, scalar_prefetch = 0 : i64, scratch_operands = 0 : i64, tpu.core_type = #tpu.core_type<tc>, window_params = [{transform_indices = @transform_0, window_bounds = array<i64: 16, 32>}, {pipeline_mode = #tpu.pipeline_mode<synchronous>, transform_indices = @transform_1, window_bounds = array<i64: 32, 256>}, {pipeline_mode = #tpu.pipeline_mode<synchronous>, transform_indices = @transform_2, window_bounds = array<i64: 1, 256>}, {pipeline_mode = #tpu.pipeline_mode<synchronous>, transform_indices = @transform_3, window_bounds = array<i64: 256, 256>}, {pipeline_mode = #tpu.pipeline_mode<synchronous>, transform_indices = @transform_4, window_bounds = array<i64: 1, 256>}, {pipeline_mode = #tpu.pipeline_mode<synchronous>, transform_indices = @transform_5, window_bounds = array<i64: 256, 128>}, {pipeline_mode = #tpu.pipeline_mode<synchronous>, transform_indices = @transform_6, window_bounds = array<i64: 1, 128>}, {transform_indices = @transform_7, window_bounds = array<i64: 16, 128>}]} {
    %c0 = arith.constant 0 : index
    %c0_0 = arith.constant 0 : index
    %0 = vector.load %arg1[%c0, %c0_0] : memref<16x32xf32, #tpu.memory_space<vmem>>, vector<16x32xf32>
    %1 = arith.truncf %0 : vector<16x32xf32> to vector<16x32xbf16>
    %c0_1 = arith.constant 0 : index
    %c0_2 = arith.constant 0 : index
    %2 = vector.load %arg2[%c0_1, %c0_2] : memref<32x256xbf16, #tpu.memory_space<vmem>>, vector<32x256xbf16>
    %cst = arith.constant dense<0.000000e+00> : vector<16x256xf32>
    %3 = tpu.matmul %1, %2, %cst {dimension_numbers = #tpu.dot_dimension_numbers<[1], [0], [0], [1], [0, 0, 1, 1], [], []>} : vector<16x32xbf16>, vector<32x256xbf16>, vector<16x256xf32> -> vector<16x256xf32>
    %4 = arith.truncf %3 : vector<16x256xf32> to vector<16x256xbf16>
    %c0_3 = arith.constant 0 : index
    %c0_4 = arith.constant 0 : index
    %5 = vector.load %arg3[%c0_3, %c0_4] : memref<1x256xf32, #tpu.memory_space<vmem>>, vector<1x256xf32>
    %6 = arith.truncf %5 : vector<1x256xf32> to vector<1x256xbf16>
    %7 = vector.broadcast %6 : vector<1x256xbf16> to vector<16x256xbf16>
    %8 = arith.addf %4, %7 : vector<16x256xbf16>
    %cst_5 = arith.constant 0.000000e+00 : bf16
    %9 = vector.broadcast %cst_5 : bf16 to vector<16x256xbf16>
    %10 = arith.maximumf %8, %9 : vector<16x256xbf16>
    %c0_6 = arith.constant 0 : index
    %c0_7 = arith.constant 0 : index
    %11 = vector.load %arg4[%c0_6, %c0_7] : memref<256x256xbf16, #tpu.memory_space<vmem>>, vector<256x256xbf16>
    %cst_8 = arith.constant dense<0.000000e+00> : vector<16x256xf32>
    %12 = tpu.matmul %10, %11, %cst_8 {dimension_numbers = #tpu.dot_dimension_numbers<[1], [0], [0], [1], [0, 0, 1, 1], [], []>} : vector<16x256xbf16>, vector<256x256xbf16>, vector<16x256xf32> -> vector<16x256xf32>
    %13 = arith.truncf %12 : vector<16x256xf32> to vector<16x256xbf16>
    %c0_9 = arith.constant 0 : index
    %c0_10 = arith.constant 0 : index
    %14 = vector.load %arg5[%c0_9, %c0_10] : memref<1x256xf32, #tpu.memory_space<vmem>>, vector<1x256xf32>
    %15 = arith.truncf %14 : vector<1x256xf32> to vector<1x256xbf16>
    %16 = vector.broadcast %15 : vector<1x256xbf16> to vector<16x256xbf16>
    %17 = arith.addf %13, %16 : vector<16x256xbf16>
    %cst_11 = arith.constant 0.000000e+00 : bf16
    %18 = vector.broadcast %cst_11 : bf16 to vector<16x256xbf16>
    %19 = arith.maximumf %17, %18 : vector<16x256xbf16>
    %c0_12 = arith.constant 0 : index
    %c0_13 = arith.constant 0 : index
    %20 = vector.load %arg6[%c0_12, %c0_13] : memref<256x128xbf16, #tpu.memory_space<vmem>>, vector<256x128xbf16>
    %cst_14 = arith.constant dense<0.000000e+00> : vector<16x128xf32>
    %21 = tpu.matmul %19, %20, %cst_14 {dimension_numbers = #tpu.dot_dimension_numbers<[1], [0], [0], [1], [0, 0, 1, 1], [], []>} : vector<16x256xbf16>, vector<256x128xbf16>, vector<16x128xf32> -> vector<16x128xf32>
    %c0_15 = arith.constant 0 : index
    %c0_16 = arith.constant 0 : index
    %22 = vector.load %arg7[%c0_15, %c0_16] : memref<1x128xf32, #tpu.memory_space<vmem>>, vector<1x128xf32>
    %23 = vector.broadcast %22 : vector<1x128xf32> to vector<16x128xf32>
    %24 = arith.addf %21, %23 : vector<16x128xf32>
    %25 = arith.truncf %24 : vector<16x128xf32> to vector<16x128xbf16>
    %c0_17 = arith.constant 0 : index
    %c0_18 = arith.constant 0 : index
    %26 = vector.load %arg8[%c0_17, %c0_18] : memref<16x128xbf16, #tpu.memory_space<vmem>>, vector<16x128xbf16>
    tpu.vector_store %arg8[%c0_17, %c0_18], %25 {strides = array<i32>} : memref<16x128xbf16, #tpu.memory_space<vmem>>, vector<16x128xbf16>,
    return
  }
  func.func @transform_0(%arg0: i32) -> (i32, i32) {
    %c0_i32 = arith.constant 0 : i32
    %c0_i32_0 = arith.constant 0 : i32
    return %arg0, %c0_i32 : i32, i32
  }
  func.func @transform_1(%arg0: i32) -> (i32, i32) {
    %c0_i32 = arith.constant 0 : i32
    %c0_i32_0 = arith.constant 0 : i32
    %c0_i32_1 = arith.constant 0 : i32
    return %c0_i32, %c0_i32_0 : i32, i32
  }
  func.func @transform_2(%arg0: i32) -> (i32, i32) {
    %c0_i32 = arith.constant 0 : i32
    %c0_i32_0 = arith.constant 0 : i32
    %c0_i32_1 = arith.constant 0 : i32
    return %c0_i32, %c0_i32_0 : i32, i32
  }
  func.func @transform_3(%arg0: i32) -> (i32, i32) {
    %c0_i32 = arith.constant 0 : i32
    %c0_i32_0 = arith.constant 0 : i32
    %c0_i32_1 = arith.constant 0 : i32
    return %c0_i32, %c0_i32_0 : i32, i32
  }
  func.func @transform_4(%arg0: i32) -> (i32, i32) {
    %c0_i32 = arith.constant 0 : i32
    %c0_i32_0 = arith.constant 0 : i32
    %c0_i32_1 = arith.constant 0 : i32
    return %c0_i32, %c0_i32_0 : i32, i32
  }
  func.func @transform_5(%arg0: i32) -> (i32, i32) {
    %c0_i32 = arith.constant 0 : i32
    %c0_i32_0 = arith.constant 0 : i32
    %c0_i32_1 = arith.constant 0 : i32
    return %c0_i32, %c0_i32_0 : i32, i32
  }
  func.func @transform_6(%arg0: i32) -> (i32, i32) {
    %c0_i32 = arith.constant 0 : i32
    %c0_i32_0 = arith.constant 0 : i32
    %c0_i32_1 = arith.constant 0 : i32
    return %c0_i32, %c0_i32_0 : i32, i32
  }
  func.func @transform_7(%arg0: i32) -> (i32, i32) {
    %c0_i32 = arith.constant 0 : i32
    %c0_i32_0 = arith.constant 0 : i32
    return %arg0, %c0_i32 : i32, i32
  }
}

</mosaic_0001>

<bundles_post_ra>
// kernel: policy_forward.1
= control target key start
LH: loop header
LB: loop body
LE: loop exit
PB: predicated region body
PF: predicated region fallthrough
CT: control target
= control target key end

     0   :  { %12 = vsyncpa [#allocation3], 0  ;;  %s1066_s0 = inlined_call_operand.vmem [shape: f32[16,32], index: 0, kind: input, shape index: {}]   ;;  %s1067_s1 = inlined_call_operand.hbm [shape: bf16[32,256], index: 1, kind: input, shape index: {}]   ;;  %s1068_s2 = inlined_call_operand.vmem [shape: f32[1,256], index: 2, kind: input, shape index: {}]   ;;  %s1069_s3 = inlined_call_operand.hbm [shape: bf16[256,256], index: 3, kind: input, shape index: {}]   ;;  %s1070_s4 = inlined_call_operand.vmem [shape: f32[1,256], index: 4, kind: input, shape index: {}]   ;;  %s1071_s5 = inlined_call_operand.hbm [shape: bf16[256,128], index: 5, kind: input, shape index: {}]   ;;  %s1072_s6 = inlined_call_operand.vmem [shape: f32[1,128], index: 6, kind: input, shape index: {}]   ;;  %s1073_s7 = inlined_call_operand.vmem [shape: bf16[16,128], index: 7, kind: output, shape index: {}]  }
   0x1   :  { %13 = vsyncpa [#allocation5], 0  ;;  %s35_s26 = sshll.u32 %s1069_s3, 4  ;;  %s990_s27 = smov [#allocation4]   ;;  %s36_s26 = int_to_ptr.hbm [resolvable:$true] %s35_s26 }
   0x2   :  { %s37_s28 = sshll.u32 %s990_s27, 4  ;;  %s20_s8 = sshll.u32 %s1067_s1, 4  ;;  %s38_s28 = int_to_ptr.vmem [resolvable:$true] %s37_s28  ;;  %s21_s8 = int_to_ptr.hbm [resolvable:$true] %s20_s8 }
   0x3   :  { %s991_s9 = smov 128   ;;  %s992_s10 = smov 8  }
   0x4   :  { %43 = dma.hbm_to_vmem [thread:$0]  %s36_s26, 4096, %s38_s28, [#allocation5], %s991_s9, %s991_s9, %s992_s10  }
   0x5   :  { %s993_s11 = smov [#allocation2]   ;;  %s50_s15 = sshll.u32 %s1071_s5, 4  ;;  %s51_s15 = int_to_ptr.hbm [resolvable:$true] %s50_s15 }
   0x6   :  { %s22_s12 = sshll.u32 %s993_s11, 4  ;;  %s994_s3 = smov [#allocation6]   ;;  %s23_s12 = int_to_ptr.vmem [resolvable:$true] %s22_s12 }
   0x7   :  { %28 = dma.hbm_to_vmem [thread:$0]  %s21_s8, 512, %s23_s12, [#allocation3], %s991_s9, %s991_s9, %s992_s10  }
   0x8   :  { %s52_s16 = sshll.u32 %s994_s3, 4  ;;  %s995_s17 = smov 64   ;;  %s53_s16 = int_to_ptr.vmem [resolvable:$true] %s52_s16 }
   0x9   :  { %s996_s18 = smov 4  }
   0xa   :  { %58 = dma.hbm_to_vmem [thread:$0]  %s51_s15, 2048, %s53_s16, [#allocation5], %s995_s17, %s995_s17, %s996_s18  }
   0xb   :  { %986 = dma.done.wait [#allocation3], 512  }
   0xc   :  { %987 = vsyncadd [#allocation3], 4294966784 }
   0xd   :  { %988 = dma.done.wait [#allocation5], 6144  }
   0xe   :  { %989 = vsyncadd [#allocation5], 4294961152  ;;  %v649_v0 = vld [vmem:[#allocation2 + $0x10] sm:$0xf]  ;;  %v852_v1 = vld [vmem:[#allocation2 + $0x14] sm:$0xf0] }
   0xf   :  { %v851_v2 = vld [vmem:[#allocation2 + $0x14] sm:$0xf]  ;;  %v650_v3 = vor.u32 %v852_v1, %v649_v0  ;;  %v651_v4 = vld [vmem:[#allocation2 + $0x18] sm:$0xf0]  ;;  %v641_v5 = vld [vmem:[#allocation2] sm:$0xf] }
  0x10   :  { %v850_v6 = vld [vmem:[#allocation2 + $0x4] sm:$0xf0]  ;;  %v654_v7 = vor.u32 %v851_v2, %v651_v4  ;;  %v849_v8 = vld [vmem:[#allocation2 + $0x4] sm:$0xf]  ;;  %v643_v9 = vld [vmem:[#allocation2 + $0x8] sm:$0xf0] }
  0x11   :  { %v74_v10 = vld [vmem:[%s1066_s0] sm:$0xff]  ;;  %111 = vmatpush.bf16.msra.mxu0 %v650_v3  ;;  %v642_v11 = vor.u32 %v850_v6, %v641_v5  ;;  %v75_v12 = vld [vmem:[%s1066_s0 + $0x8] sm:$0xff]  ;;  %vm101_vm0 = vcmask 261120   ;;  %v715_v13 = vld [vmem:[#allocation4 + $0x70] sm:$0xf]  ;;  %v646_v15 = vor.u32 %v849_v8, %v643_v9 }
  0x12   :  { %v868_v14 = vld [vmem:[#allocation4 + $0x74] sm:$0xf0]  ;;  %125 = vmatpush.bf16.msra.mxu1 %v654_v7  ;;  %v779_v17 = vld [vmem:[#allocation4 + $0xf0] sm:$0xf]  ;;  %v867_v19 = vld [vmem:[#allocation4 + $0x74] sm:$0xf]  ;;  %v76_v24 = vpack.c.bf16 %v75_v12, %v74_v10 }
  0x13   :  { %v716_v16 = vor.u32 %v868_v14, %v715_v13  ;;  %v884_v18 = vld [vmem:[#allocation4 + $0xf4] sm:$0xf0]  ;;  %v717_v21 = vld [vmem:[#allocation4 + $0x78] sm:$0xf0]  ;;  %v883_v22 = vld [vmem:[#allocation4 + $0xf4] sm:$0xf] }
  0x14   :  { %v780_v20 = vor.u32 %v884_v18, %v779_v17  ;;  %v781_v23 = vld [vmem:[#allocation4 + $0xf8] sm:$0xf0]  ;;  %v720_v25 = vor.u32 %v867_v19, %v717_v21  ;;  %v707_v27 = vld [vmem:[#allocation4 + $0x60] sm:$0xf]  ;;  %v866_v28 = vld [vmem:[#allocation4 + $0x64] sm:$0xf0] }
  0x15   :  { %369 = vmatpush.bf16.msra.mxu2 %v716_v16  ;;  %v784_v26 = vor.u32 %v883_v22, %v781_v23  ;;  %v771_v29 = vld [vmem:[#allocation4 + $0xe0] sm:$0xf]  ;;  %112 = vmatpush.bf16.msra.mxu0 %v642_v11  ;;  %v708_v30 = vor.u32 %v866_v28, %v707_v27  ;;  %v882_v31 = vld [vmem:[#allocation4 + $0xe4] sm:$0xf0]  ;;  %v865_v32 = vld [vmem:[#allocation4 + $0x64] sm:$0xf] }
  0x16   :  { %383 = vmatpush.bf16.msra.mxu3 %v780_v20  ;;  %v709_v33 = vld [vmem:[#allocation4 + $0x68] sm:$0xf0]  ;;  %126 = vmatpush.bf16.msra.mxu1 %v646_v15  ;;  %v772_v34 = vor.u32 %v882_v31, %v771_v29  ;;  %v881_v36 = vld [vmem:[#allocation4 + $0xe4] sm:$0xf]  ;;  %v699_v38 = vld [vmem:[#allocation4 + $0x50] sm:$0xf] }
  0x17   :  { %v712_v35 = vor.u32 %v865_v32, %v709_v33  ;;  %v773_v37 = vld [vmem:[#allocation4 + $0xe8] sm:$0xf0]  ;;  %v864_v40 = vld [vmem:[#allocation4 + $0x54] sm:$0xf0]  ;;  %v763_v41 = vld [vmem:[#allocation4 + $0xd0] sm:$0xf] }
  0x18   :  { %v776_v39 = vor.u32 %v881_v36, %v773_v37  ;;  %v880_v42 = vld [vmem:[#allocation4 + $0xd4] sm:$0xf0]  ;;  %655 = vmatmul.msk.bf16.vlgmr.msra.gmra.mxu0 %vm101_vm0, %v76_v24  ;;  %v700_v43 = vor.u32 %v864_v40, %v699_v38  ;;  %v863_v44 = vld [vmem:[#allocation4 + $0x54] sm:$0xf]  ;;  %v701_v45 = vld [vmem:[#allocation4 + $0x58] sm:$0xf0] }
  0x19   :  { %397 = vmatpush.bf16.msrb.mxu0 %v720_v25  ;;  %370 = vmatpush.bf16.msra.mxu2 %v708_v30  ;;  %v879_v46 = vld [vmem:[#allocation4 + $0xd4] sm:$0xf]  ;;  %v764_v47 = vor.u32 %v880_v42, %v763_v41  ;;  %v765_v48 = vld [vmem:[#allocation4 + $0xd8] sm:$0xf0]  ;;  %v704_v49 = vor.u32 %v863_v44, %v701_v45  ;;  %v691_v51 = vld [vmem:[#allocation4 + $0x40] sm:$0xf] }
  0x1a   :  { %411 = vmatpush.bf16.msrb.mxu1 %v784_v26  ;;  %384 = vmatpush.bf16.msra.mxu3 %v772_v34  ;;  %v768_v50 = vor.u32 %v879_v46, %v765_v48  ;;  %v862_v52 = vld [vmem:[#allocation4 + $0x44] sm:$0xf0]  ;;  %v755_v53 = vld [vmem:[#allocation4 + $0xc0] sm:$0xf]  ;;  %v861_v56 = vld [vmem:[#allocation4 + $0x44] sm:$0xf] }
  0x1b   :  { %656 = vmatmul.msk.bf16.vlgmr.msra.gmra.mxu1 %vm101_vm0, %v76_v24  ;;  %v692_v54 = vor.u32 %v862_v52, %v691_v51  ;;  %v878_v55 = vld [vmem:[#allocation4 + $0xc4] sm:$0xf0]  ;;  %v693_v57 = vld [vmem:[#allocation4 + $0x48] sm:$0xf0]  ;;  %v877_v60 = vld [vmem:[#allocation4 + $0xc4] sm:$0xf] }
  0x1c   :  { %v756_v58 = vor.u32 %v878_v55, %v755_v53  ;;  %v696_v59 = vor.u32 %v861_v56, %v693_v57  ;;  %v757_v61 = vld [vmem:[#allocation4 + $0xc8] sm:$0xf0]  ;;  %v683_v63 = vld [vmem:[#allocation4 + $0x30] sm:$0xf]  ;;  %v860_v0 = vld [vmem:[#allocation4 + $0x34] sm:$0xf0] }
  0x1d   :  { %398 = vmatpush.bf16.msrb.mxu0 %v712_v35  ;;  %371 = vmatpush.bf16.msra.mxu2 %v700_v43  ;;  %v760_v62 = vor.u32 %v877_v60, %v757_v61  ;;  %v747_v1 = vld [vmem:[#allocation4 + $0xb0] sm:$0xf]  ;;  %v684_v2 = vor.u32 %v860_v0, %v683_v63  ;;  %v876_v3 = vld [vmem:[#allocation4 + $0xb4] sm:$0xf0]  ;;  %v859_v4 = vld [vmem:[#allocation4 + $0x34] sm:$0xf] }
  0x1e   :  { %412 = vmatpush.bf16.msrb.mxu1 %v776_v39  ;;  %385 = vmatpush.bf16.msra.mxu3 %v764_v47  ;;  %v685_v5 = vld [vmem:[#allocation4 + $0x38] sm:$0xf0]  ;;  %v748_v6 = vor.u32 %v876_v3, %v747_v1  ;;  %v875_v8 = vld [vmem:[#allocation4 + $0xb4] sm:$0xf]  ;;  %v675_v11 = vld [vmem:[#allocation4 + $0x20] sm:$0xf] }
  0x1f   :  { %v688_v7 = vor.u32 %v859_v4, %v685_v5  ;;  %v749_v9 = vld [vmem:[#allocation4 + $0xb8] sm:$0xf0]  ;;  %v858_v12 = vld [vmem:[#allocation4 + $0x24] sm:$0xf0]  ;;  %v739_v13 = vld [vmem:[#allocation4 + $0xa0] sm:$0xf] }
  0x20   :  { %v752_v10 = vor.u32 %v875_v8, %v749_v9  ;;  %v676_v14 = vor.u32 %v858_v12, %v675_v11  ;;  %v874_v15 = vld [vmem:[#allocation4 + $0xa4] sm:$0xf0]  ;;  %v857_v16 = vld [vmem:[#allocation4 + $0x24] sm:$0xf]  ;;  %v677_v17 = vld [vmem:[#allocation4 + $0x28] sm:$0xf0] }
  0x21   :  { %399 = vmatpush.bf16.msrb.mxu0 %v704_v49  ;;  %372 = vmatpush.bf16.msra.mxu2 %v692_v54  ;;  %v740_v18 = vor.u32 %v874_v15, %v739_v13  ;;  %v680_v19 = vor.u32 %v857_v16, %v677_v17  ;;  %v873_v20 = vld [vmem:[#allocation4 + $0xa4] sm:$0xf]  ;;  %v741_v21 = vld [vmem:[#allocation4 + $0xa8] sm:$0xf0]  ;;  %v667_v23 = vld [vmem:[#allocation4 + $0x10] sm:$0xf] }
  0x22   :  { %413 = vmatpush.bf16.msrb.mxu1 %v768_v50  ;;  %386 = vmatpush.bf16.msra.mxu3 %v756_v58  ;;  %v744_v22 = vor.u32 %v873_v20, %v741_v21  ;;  %v856_v24 = vld [vmem:[#allocation4 + $0x14] sm:$0xf0]  ;;  %v731_v25 = vld [vmem:[#allocation4 + $0x90] sm:$0xf]  ;;  %v855_v28 = vld [vmem:[#allocation4 + $0x14] sm:$0xf] }
  0x23   :  { %v668_v26 = vor.u32 %v856_v24, %v667_v23  ;;  %v872_v27 = vld [vmem:[#allocation4 + $0x94] sm:$0xf0]  ;;  %v669_v29 = vld [vmem:[#allocation4 + $0x18] sm:$0xf0]  ;;  %v135_v30 = vld [vmem:[%s1068_s2] sm:$0x3] }
  0x24   :  { %v732_v31 = vor.u32 %v872_v27, %v731_v25  ;;  %v672_v32 = vor.u32 %v855_v28, %v669_v29  ;;  %v871_v33 = vld [vmem:[#allocation4 + $0x94] sm:$0xf]  ;;  %v733_v34 = vld [vmem:[#allocation4 + $0x98] sm:$0xf0]  ;;  %v659_v35 = vld [vmem:[#allocation4] sm:$0xf] }
  0x25   :  { %400 = vmatpush.bf16.msrb.mxu0 %v696_v59  ;;  %373 = vmatpush.bf16.msra.mxu2 %v684_v2  ;;  %v736_v36 = vor.u32 %v871_v33, %v733_v34  ;;  %v854_v37 = vld [vmem:[#allocation4 + $0x4] sm:$0xf0]  ;;  %v723_v38 = vld [vmem:[#allocation4 + $0x80] sm:$0xf]  ;;  %v853_v42 = vld [vmem:[#allocation4 + $0x4] sm:$0xf] }
  0x26   :  { %414 = vmatpush.bf16.msrb.mxu1 %v760_v62  ;;  %387 = vmatpush.bf16.msra.mxu3 %v748_v6  ;;  %v870_v39 = vld [vmem:[#allocation4 + $0x84] sm:$0xf0]  ;;  %v660_v40 = vor.u32 %v854_v37, %v659_v35  ;;  %v661_v43 = vld [vmem:[#allocation4 + $0x8] sm:$0xf0]  ;;  %v869_v44 = vld [vmem:[#allocation4 + $0x84] sm:$0xf] }
  0x27   :  { %v724_v41 = vor.u32 %v870_v39, %v723_v38  ;;  %v664_v45 = vor.u32 %v853_v42, %v661_v43  ;;  %v725_v46 = vld [vmem:[#allocation4 + $0x88] sm:$0xf0]  ;;  %v137_v48 = vperm.slane %v135_v30, 0  ;;  %v138_v49 = vperm.slane %v135_v30, 1  ;;  %v892_v51 = vld [vmem:[#allocation6 + $0x38] sm:$0xff]  ;;  %v899_v20 = vld [vmem:[#allocation6 + $0x70] sm:$0xff] }
  0x28   :  { %v728_v47 = vor.u32 %v869_v44, %v725_v46  ;;  %v900_v52 = vld [vmem:[#allocation6 + $0x78] sm:$0xff]  ;;  %v890_v21 = vld [vmem:[#allocation6 + $0x28] sm:$0xff]  ;;  %v889_v23 = vld [vmem:[#allocation6 + $0x20] sm:$0xff] }
  0x29   :  { %401 = vmatpush.bf16.msrb.mxu0 %v688_v7  ;;  %374 = vmatpush.bf16.msra.mxu2 %v676_v14  ;;  %v141_v50 = vpack.c.bf16 %v138_v49, %v137_v48  ;;  %v897_v24 = vld [vmem:[#allocation6 + $0x60] sm:$0xff]  ;;  %v888_v25 = vld [vmem:[#allocation6 + $0x18] sm:$0xff]  ;;  %v887_v27 = vld [vmem:[#allocation6 + $0x10] sm:$0xff] }
  0x2a   :  { %415 = vmatpush.bf16.msrb.mxu1 %v752_v10  ;;  %388 = vmatpush.bf16.msra.mxu3 %v740_v18  ;;  %v895_v28 = vld [vmem:[#allocation6 + $0x50] sm:$0xff]  ;;  %v886_v29 = vld [vmem:[#allocation6 + $0x8] sm:$0xff]  ;;  %v893_v33 = vld [vmem:[#allocation6 + $0x40] sm:$0xff] }
  0x2b   :  { %v143_v53 = vunpack.c.l.b16 %v141_v50  ;;  %v144_v54 = vunpack.c.h.b16 %v141_v50  ;;  %v894_v30 = vld [vmem:[#allocation6 + $0x48] sm:$0xff] }
  0x2d   :  { %402 = vmatpush.bf16.msrb.mxu0 %v680_v19  ;;  %375 = vmatpush.bf16.msra.mxu2 %v668_v26  ;;  %v145_v55 = vpack.c.b16 %v143_v53, %v143_v53  ;;  %v146_v56 = vpack.c.b16 %v144_v54, %v144_v54  ;;  %v891_v19 = vld [vmem:[#allocation6 + $0x30] sm:$0xff]  ;;  %v896_v26 = vld [vmem:[#allocation6 + $0x58] sm:$0xff] }
  0x2e   :  { %416 = vmatpush.bf16.msrb.mxu1 %v744_v22  ;;  %389 = vmatpush.bf16.msra.mxu3 %v732_v31  ;;  %v898_v22 = vld [vmem:[#allocation6 + $0x68] sm:$0xff]  ;;  %v427_v31 = vld [vmem:[%s1070_s4] sm:$0x3] }
  0x2f   :  { %v148_v58 = vpack.i.b16 %v145_v55, %v145_v55  ;;  %v152_v59 = vpack.i.b16 %v146_v56, %v146_v56  ;;  %v429_v34 = vperm.slane %v427_v31, 0  ;;  %v430_v35 = vperm.slane %v427_v31, 1 }
  0x31   :  { %403 = vmatpush.bf16.msrb.mxu0 %v672_v32  ;;  %376 = vmatpush.bf16.msra.mxu2 %v660_v40  ;;  %v150_v62 = vperm.slane %v148_v58, 0  ;;  %v154_v63 = vperm.slane %v152_v59, 0  ;;  %v885_v32 = vld [vmem:[#allocation6] sm:$0xff] }
  0x32   :  { %417 = vmatpush.bf16.msrb.mxu1 %v736_v36  ;;  %390 = vmatpush.bf16.msra.mxu3 %v724_v41  ;;  %v433_v36 = vpack.c.bf16 %v430_v35, %v429_v34 }
  0x33   :  { %v159_v3 = vunpack.c.l.bf16 %v150_v62  ;;  %v160_v4 = vunpack.c.l.bf16 %v154_v63 }
  0x34   :  { %v435_v37 = vunpack.c.l.b16 %v433_v36  ;;  %v436_v38 = vunpack.c.h.b16 %v433_v36 }
  0x35   :  { %404 = vmatpush.bf16.msrb.mxu0 %v664_v45  ;;  %601 = vmatpush.bf16.msrb.mxu2 %v892_v51 }
  0x36   :  { %418 = vmatpush.bf16.msrb.mxu1 %v728_v47  ;;  %615 = vmatpush.bf16.msrb.mxu3 %v900_v52  ;;  %v437_v41 = vpack.c.b16 %v435_v37, %v435_v37  ;;  %v438_v42 = vpack.c.b16 %v436_v38, %v436_v38 }
  0x38   :  { %v440_v45 = vpack.i.b16 %v437_v41, %v437_v41  ;;  %v444_v46 = vpack.i.b16 %v438_v42, %v438_v42 }
  0x39   :  { %602 = vmatpush.bf16.msrb.mxu2 %v891_v19 }
  0x3a   :  { %616 = vmatpush.bf16.msrb.mxu3 %v899_v20  ;;  %v442_v49 = vperm.slane %v440_v45, 0  ;;  %v446_v50 = vperm.slane %v444_v46, 0 }
  0x3c   :  { %v451_v56 = vunpack.c.l.bf16 %v442_v49 }
  0x3d   :  { %603 = vmatpush.bf16.msrb.mxu2 %v890_v21 }
  0x3e   :  { %617 = vmatpush.bf16.msrb.mxu3 %v898_v22 }
  0x41   :  { %604 = vmatpush.bf16.msrb.mxu2 %v889_v23 }
  0x42   :  { %618 = vmatpush.bf16.msrb.mxu3 %v897_v24 }
  0x45   :  { %605 = vmatpush.bf16.msrb.mxu2 %v888_v25 }
  0x46   :  { %619 = vmatpush.bf16.msrb.mxu3 %v896_v26 }
  0x49   :  { %606 = vmatpush.bf16.msrb.mxu2 %v887_v27 }
  0x4a   :  { %620 = vmatpush.bf16.msrb.mxu3 %v895_v28 }
  0x4d   :  { %607 = vmatpush.bf16.msrb.mxu2 %v886_v29 }
  0x4e   :  { %621 = vmatpush.bf16.msrb.mxu3 %v894_v30 }
  0x51   :  { %608 = vmatpush.bf16.msrb.mxu2 %v885_v32 }
  0x52   :  { %622 = vmatpush.bf16.msrb.mxu3 %v893_v33 }
  0x95   :  { %v114_v57 = vpop.f32.mrf.mxu0 }
  0x98   :  { %v128_v60 = vpop.f32.mrf.mxu1 }
  0x99   :  { %v133_v61 = vpack.c.bf16 %v128_v60, %v114_v57  ;;  %v452_v57 = vunpack.c.l.bf16 %v446_v50 }
  0x9b   :  { %v155_v0 = vunpack.c.l.bf16 %v133_v61  ;;  %v156_v1 = vunpack.c.h.bf16 %v133_v61 }
  0x9d   :  { %v116_v2 = vpop.f32.mrf.mxu0  ;;  %v161_v9 = vadd.f32 %v159_v3, %v155_v0  ;;  %v162_v10 = vadd.f32 %v160_v4, %v156_v1 }
  0x9f   :  { %v171_v13 = vmax.f32 %v161_v9, 0.0  ;;  %v172_v15 = vmax.f32 %v162_v10, 0.0 }
  0xa0   :  { %v130_v5 = vpop.f32.mrf.mxu1 }
  0xa1   :  { %v134_v6 = vpack.c.bf16 %v130_v5, %v116_v2 }
  0xa3   :  { %v157_v7 = vunpack.c.l.bf16 %v134_v6  ;;  %v158_v8 = vunpack.c.h.bf16 %v134_v6 }
  0xa5   :  { %v163_v11 = vadd.f32 %v159_v3, %v157_v7  ;;  %v164_v12 = vadd.f32 %v160_v4, %v158_v8 }
  0xa7   :  { %v173_v14 = vmax.f32 %v163_v11, 0.0  ;;  %v174_v16 = vmax.f32 %v164_v12, 0.0 }
  0xa9   :  { %v175_v17 = vpack.c.bf16 %v173_v14, %v171_v13  ;;  %v176_v18 = vpack.c.bf16 %v174_v16, %v172_v15  ;;  %v913_v13 = vld [vmem:[%s1072_s6] ss:$0 sm:$0xff] }
  0xab   :  { %377 = vmatmul.bf16.vlgmr.msra.gmra.mxu2 %v175_v17  ;;  %391 = vmatmul.bf16.vlgmr.msra.gmra.mxu3 %v176_v18 }
  0xac   :  { %405 = vmatmul.bf16.vlgmr.msrb.gmra.mxu0 %v175_v17  ;;  %419 = vmatmul.bf16.vlgmr.msrb.gmra.mxu1 %v176_v18 }
 0x129   :  { %v406_v39 = vpop.f32.mrf.mxu0  ;;  %v420_v40 = vpop.f32.mrf.mxu1 }
 0x12a   :  { %v421_v48 = vadd.f32 %v420_v40, %v406_v39 }
 0x12e   :  { %v378_v43 = vpop.f32.mrf.mxu2  ;;  %v392_v44 = vpop.f32.mrf.mxu3 }
 0x12f   :  { %v393_v47 = vadd.f32 %v392_v44, %v378_v43 }
 0x131   :  { %v425_v51 = vpack.c.bf16 %v421_v48, %v393_v47  ;;  %v408_v52 = vpop.f32.mrf.mxu0  ;;  %v422_v53 = vpop.f32.mrf.mxu1 }
 0x132   :  { %v423_v60 = vadd.f32 %v422_v53, %v408_v52 }
 0x133   :  { %v447_v58 = vunpack.c.l.bf16 %v425_v51  ;;  %v448_v59 = vunpack.c.h.bf16 %v425_v51 }
 0x135   :  { %v453_v1 = vadd.f32 %v451_v56, %v447_v58  ;;  %v454_v2 = vadd.f32 %v452_v57, %v448_v59 }
 0x136   :  { %v380_v54 = vpop.f32.mrf.mxu2  ;;  %v394_v55 = vpop.f32.mrf.mxu3 }
 0x137   :  { %v395_v61 = vadd.f32 %v394_v55, %v380_v54  ;;  %v463_v5 = vmax.f32 %v453_v1, 0.0  ;;  %v464_v7 = vmax.f32 %v454_v2, 0.0 }
 0x139   :  { %v426_v62 = vpack.c.bf16 %v423_v60, %v395_v61 }
 0x13b   :  { %v449_v63 = vunpack.c.l.bf16 %v426_v62  ;;  %v450_v0 = vunpack.c.h.bf16 %v426_v62 }
 0x13d   :  { %v455_v3 = vadd.f32 %v451_v56, %v449_v63  ;;  %v456_v4 = vadd.f32 %v452_v57, %v450_v0 }
 0x13f   :  { %v465_v6 = vmax.f32 %v455_v3, 0.0  ;;  %v466_v8 = vmax.f32 %v456_v4, 0.0 }
 0x141   :  { %v467_v9 = vpack.c.bf16 %v465_v6, %v463_v5  ;;  %v468_v10 = vpack.c.bf16 %v466_v8, %v464_v7 }
 0x143   :  { %609 = vmatmul.bf16.vlgmr.msrb.gmra.mxu2 %v467_v9  ;;  %623 = vmatmul.bf16.vlgmr.msrb.gmra.mxu3 %v468_v10 }
 0x1c6   :  { %v610_v11 = vpop.f32.mrf.mxu2  ;;  %v624_v12 = vpop.f32.mrf.mxu3 }
 0x1c7   :  { %v611_v14 = vadd.f32 %v913_v13, %v610_v11 }
 0x1c9   :  { %v625_v18 = vadd.f32 %v624_v12, %v611_v14 }
 0x1ce   :  { %v612_v15 = vpop.f32.mrf.mxu2  ;;  %v626_v17 = vpop.f32.mrf.mxu3 }
 0x1cf   :  { %v613_v16 = vadd.f32 %v913_v13, %v612_v15 }
 0x1d1   :  { %v627_v19 = vadd.f32 %v626_v17, %v613_v16 }
 0x1d3   :  { %v904_v20 = vpack.c.bf16 %v627_v19, %v625_v18 }
 0x1d5   :  { %905 = vst [vmem:[%s1073_s7] sm:$0xff] %v904_v20  }
 0x1d6   :  { %637 = vsyncpa [#allocation3], 1 }
 0x1d7   :  { %638 = vsyncpa [#allocation5], 1 }

</bundles_post_ra>
